<compile_context>
chip_gen: v6e
topology: v6e:2x2x1
jax: 0.10.0
libtpu: 0.0.40
codegen_flags: <defaults>
</compile_context>

<pallas_src>
import math
from functools import partial

import jax
import jax.numpy as jnp
from jax.experimental import pallas as pl
from jax.experimental.pallas import tpu as pltpu


# ----------------------------------------------------------------------------
# Small utilities.
# ----------------------------------------------------------------------------
def _round_up(x, m):
    return ((x + m - 1) // m) * m


def _vmem_capacity_bytes():
    try:
        info = pltpu.get_tpu_info()
        cap = getattr(info, "vmem_capacity_bytes", None)
        if cap:
            return int(cap)
    except Exception:
        pass
    return 64 * (1 << 20)  # conservative default (v7x per-TC VMEM)


_VARIANT_CACHE = {}


def _run_first_working(cache_key, builders):
    """Try kernel variants in order, cache the first one that compiles+runs.

    builders: list of (name, zero-arg callable).  Used to probe optional
    features (pl.Buffered(1) single buffering, in-kernel dynamic gather) so the
    script always runs even if a feature is unavailable in the current JAX.
    """
    if cache_key in _VARIANT_CACHE:
        return builders[_VARIANT_CACHE[cache_key]][1]()
    last_exc = None
    for idx, (_name, fn) in enumerate(builders):
        try:
            out = jax.block_until_ready(fn())
        except Exception as exc:  # lowering/compile probe -> try next variant
            last_exc = exc
            continue
        _VARIANT_CACHE[cache_key] = idx
        return out
    raise last_exc


# ----------------------------------------------------------------------------
# Shared math helpers.
# ----------------------------------------------------------------------------
def _layer_norm(x, g, b, eps=1e-5):
    mean = jnp.mean(x, axis=-1, keepdims=True)
    var = jnp.mean(jnp.square(x - mean), axis=-1, keepdims=True)
    return (x - mean) * jax.lax.rsqrt(var + eps) * g + b


def _softmax_ref(x):
    x = x - jnp.max(x, axis=-1, keepdims=True)
    e = jnp.exp(x)
    return e / jnp.sum(e, axis=-1, keepdims=True)


def _softmax_in_kernel(x):
    # exp on EUP; denominator reciprocal on EUP (approx) instead of a VALU divide.
    x = x - jnp.max(x, axis=-1, keepdims=True)
    e = jnp.exp(x)
    return e * pl.reciprocal(jnp.sum(e, axis=-1, keepdims=True), approx=True)


def _gelu_tanh(x):
    # TODO(synk): torch nn.GELU default is the exact erf formulation; tanh approx used here.
    c = math.sqrt(2.0 / math.pi)
    return 0.5 * x * (1.0 + jnp.tanh(c * (x + 0.044715 * x * x * x)))


# ----------------------------------------------------------------------------
# Kernel 1: token + positional embedding gather (VMEM-resident tables,
# vectorized gather, lane-dense (TB, D) output tiles).
# ----------------------------------------------------------------------------
def _embed_kernel_take(tok_ids_ref, pos_ids_ref, tok_tab_ref, pos_tab_ref, out_ref):
    tok_ids = tok_ids_ref[0, 0]                               # (tb,) int32
    pos_ids = pos_ids_ref[0, 0]
    tok = jnp.take(tok_tab_ref[...], tok_ids, axis=0, mode="clip")
    pos = jnp.take(pos_tab_ref[...], pos_ids, axis=0, mode="clip")
    out_ref[...] = (tok + pos).astype(out_ref.dtype)


def _one_hot_gather(ids_row, table):
    # ids_row: (1, tb) int32; table: (V, d).  Builds the transposed one-hot
    # (V, tb) so no lane->sublane relayout of the ids is needed, then contracts
    # the V axis on the MXU:  out[r, :] = table[ids[r], :].
    v = table.shape[0]
    tb = ids_row.shape[1]
    row_ids = jax.lax.broadcasted_iota(jnp.int32, (v, tb), 0)
    oh_t = (row_ids == ids_row).astype(table.dtype)
    return jax.lax.dot_general(oh_t, table, (((0,), (0,)), ((), ())),
                               preferred_element_type=jnp.float32)


def _embed_kernel_onehot(tok_ids_ref, pos_ids_ref, tok_tab_ref, pos_tab_ref, out_ref):
    tok = _one_hot_gather(tok_ids_ref[0], tok_tab_ref[...])
    pos = _one_hot_gather(pos_ids_ref[0], pos_tab_ref[...])
    out_ref[...] = (tok + pos).astype(out_ref.dtype)


def embed_tokens(tok_table, pos_table, tokens, *, tile_rows=256):
    """token_emb[tokens] + pos_emb[arange(S)]  ->  (B, S, D)."""
    b, s = tokens.shape
    vocab, d = tok_table.shape
    assert s <= pos_table.shape[0]
    n = b * s

    tok_ids = tokens.reshape(-1).astype(jnp.int32)
    pos_ids = jnp.tile(jnp.arange(s, dtype=jnp.int32), b)

    itemsize = jnp.dtype(tok_table.dtype).itemsize
    table_bytes = (tok_table.size + pos_table.size) * itemsize
    cap = _vmem_capacity_bytes()

    # Production-sized vocabularies cannot (and should not) be VMEM-resident:
    # the op is a pure mem-bound gather, so use XLA's native HBM gather there.
    # TODO(synk): HBM-side Pallas gather (pl.Element row DMA) for large vocab.
    if n < 8 or table_bytes > int(0.45 * cap):
        return (tok_table[tok_ids] + pos_table[pos_ids]).reshape(b, s, d)

    tb = _round_up(int(min(tile_rows, _round_up(n, 8))), 8)
    n_pad = _round_up(n, tb)
    pad = n_pad - n
    if pad:
        tok_ids = jnp.concatenate([tok_ids, jnp.zeros((pad,), jnp.int32)])
        pos_ids = jnp.concatenate([pos_ids, jnp.zeros((pad,), jnp.int32)])
    n_tiles = n_pad // tb
    tok_ids3d = tok_ids.reshape(n_tiles, 1, tb)
    pos_ids3d = pos_ids.reshape(n_tiles, 1, tb)

    out_bytes = n_pad * d * itemsize
    cost = pl.CostEstimate(flops=n_pad * d, transcendentals=0,
                           bytes_accessed=table_bytes + out_bytes + 8 * n_pad)

    def build(use_take, single_buffer):
        kernel_fn = _embed_kernel_take if use_take else _embed_kernel_onehot
        tab_kwargs = {"pipeline_mode": pl.Buffered(1)} if single_buffer else {}
        in_specs = [
            pl.BlockSpec((1, 1, tb), lambda i: (i, 0, 0)),
            pl.BlockSpec((1, 1, tb), lambda i: (i, 0, 0)),
            pl.BlockSpec((vocab, d), lambda i: (0, 0), **tab_kwargs),
            pl.BlockSpec(pos_table.shape, lambda i: (0, 0), **tab_kwargs),
        ]
        needed = (table_bytes * (1 if single_buffer else 2)
                  + 4 * tb * d * itemsize + (1 << 20))
        vmem_limit = int(min(max(needed, 16 << 20), 0.9 * cap))
        return pl.pallas_call(
            kernel_fn,
            grid=(n_tiles,),
            in_specs=in_specs,
            out_specs=pl.BlockSpec((tb, d), lambda i: (i, 0)),
            out_shape=jax.ShapeDtypeStruct((n_pad, d), tok_table.dtype),
            compiler_params=pltpu.CompilerParams(
                dimension_semantics=("parallel",),
                vmem_limit_bytes=vmem_limit),
            cost_estimate=cost,
        )(tok_ids3d, pos_ids3d, tok_table, pos_table)

    out = _run_first_working(
        "embed_gather",
        [("take_single_buffer", lambda: build(True, True)),
         ("take_double_buffer", lambda: build(True, False)),
         ("onehot_single_buffer", lambda: build(False, True)),
         ("onehot_double_buffer", lambda: build(False, False))])
    return out[:n].reshape(b, s, d)


# ----------------------------------------------------------------------------
# Kernel 2: fused pre-norm encoder layer (attention + FF), bf16 matmuls,
# f32 statistics/accumulation, optional fused final LayerNorm.
# ----------------------------------------------------------------------------
def _encoder_layer_kernel(*args, heads, dim_head, tb, apply_final_norm):
    if apply_final_norm:
        (x_ref, ln1_g, ln1_b, wqkv, wo, bo,
         ln2_g, ln2_b, w1, b1, w2, b2, fng, fnb, o_ref) = args
    else:
        (x_ref, ln1_g, ln1_b, wqkv, wo, bo,
         ln2_g, ln2_b, w1, b1, w2, b2, o_ref) = args
        fng = fnb = None

    s = x_ref.shape[1]
    d = x_ref.shape[2]
    inner = heads * dim_head
    cdt = wqkv.dtype                       # compute (matmul operand) dtype
    rows = tb * s
    scale = 1.0 / math.sqrt(float(dim_head))

    # Residual stream kept in f32.
    x = x_ref[...].reshape(rows, d).astype(jnp.float32)

    # --- attention block (pre-norm, residual) ---
    h = _layer_norm(x, ln1_g[0], ln1_b[0])
    qkv = jnp.dot(h.astype(cdt), wqkv[...],
                  preferred_element_type=jnp.float32)          # (rows, 3*inner)
    qkv = qkv.reshape(tb, s, 3 * inner)

    att_rows = []
    for bi in range(tb):                                       # static unroll
        acc = jnp.zeros((s, d), jnp.float32)
        for hh in range(heads):                                # static unroll
            lo = hh * dim_head
            qh = qkv[bi, :, lo:lo + dim_head]
            kh = qkv[bi, :, inner + lo:inner + lo + dim_head]
            vh = qkv[bi, :, 2 * inner + lo:2 * inner + lo + dim_head]
            scores = jax.lax.dot_general(
                qh.astype(cdt), kh.astype(cdt), (((1,), (1,)), ((), ())),
                preferred_element_type=jnp.float32) * scale    # (s, s)
            p = _softmax_in_kernel(scores)
            pv = jnp.dot(p.astype(cdt), vh.astype(cdt),
                         preferred_element_type=jnp.float32)   # (s, dim_head)
            # Accumulate through the matching Wo row-slice: no lane-concat of
            # half-vreg head outputs.
            acc = acc + jnp.dot(pv.astype(cdt), wo[lo:lo + dim_head, :],
                                preferred_element_type=jnp.float32)
        att_rows.append(acc)
    att = att_rows[0] if tb == 1 else jnp.concatenate(att_rows, axis=0)
    x = x + att + bo[0]

    # --- feed-forward block (pre-norm, residual) ---
    h2 = _layer_norm(x, ln2_g[0], ln2_b[0])
    ff = jnp.dot(h2.astype(cdt), w1[...],
                 preferred_element_type=jnp.float32) + b1[0]
    ff = _gelu_tanh(ff)
    x = x + jnp.dot(ff.astype(cdt), w2[...],
                    preferred_element_type=jnp.float32) + b2[0]

    if apply_final_norm:
        x = _layer_norm(x, fng[0], fnb[0])

    o_ref[...] = x.reshape(tb, s, d).astype(o_ref.dtype)


def encoder_layer(x, prepped, *, heads, dim_head, final_norm=None, batch_tile=None):
    b, s, d = x.shape
    inner = heads * dim_head
    ff_inner = prepped['w1'].shape[1]

    if batch_tile is None:
        batch_tile = 1
        for cand in (8, 4, 2):
            if b % cand == 0:
                batch_tile = cand
                break
    tb = batch_tile
    assert b % tb == 0

    weights = [
        prepped['ln1_g'], prepped['ln1_b'],
        prepped['wqkv'], prepped['wo'], prepped['bo'],
        prepped['ln2_g'], prepped['ln2_b'],
        prepped['w1'], prepped['b1'], prepped['w2'], prepped['b2'],
    ]
    apply_final = final_norm is not None
    if apply_final:
        weights += [final_norm[0].reshape(1, d), final_norm[1].reshape(1, d)]

    weight_bytes = sum(int(w.size) * jnp.dtype(w.dtype).itemsize for w in weights)
    act_block_bytes = tb * s * d * 4
    cap = _vmem_capacity_bytes()

    rows = b * s
    flops = (2 * rows * d * (3 * inner)            # fused QKV
             + 2 * rows * s * inner * 2            # scores + PV
             + 2 * rows * inner * d                # output projection
             + 2 * rows * d * ff_inner * 2)        # FF
    transc = rows * (heads * s + ff_inner)
    cost = pl.CostEstimate(flops=int(flops), transcendentals=int(transc),
                           bytes_accessed=int(weight_bytes * (b // tb)
                                              + 3 * rows * d * 4))

    kernel = partial(_encoder_layer_kernel, heads=heads, dim_head=dim_head,
                     tb=tb, apply_final_norm=apply_final)
    x_spec = pl.BlockSpec((tb, s, d), lambda i: (i, 0, 0))

    def build(single_buffer):
        def wspec(arr):
            nd = arr.ndim
            kwargs = {"pipeline_mode": pl.Buffered(1)} if single_buffer else {}
            return pl.BlockSpec(arr.shape, lambda i, _n=nd: (0,) * _n, **kwargs)

        in_specs = [x_spec] + [wspec(w) for w in weights]
        needed = (weight_bytes * (1 if single_buffer else 2)
                  + 6 * act_block_bytes + (2 << 20))
        vmem_limit = int(min(max(needed, 32 << 20), 0.9 * cap))
        return pl.pallas_call(
            kernel,
            grid=(b // tb,),
            in_specs=in_specs,
            out_specs=pl.BlockSpec((tb, s, d), lambda i: (i, 0, 0)),
            out_shape=jax.ShapeDtypeStruct((b, s, d), x.dtype),
            compiler_params=pltpu.CompilerParams(
                dimension_semantics=("parallel",),
                vmem_limit_bytes=vmem_limit),
            cost_estimate=cost,
        )(x, *weights)

    return _run_first_working(
        "encoder_layer",
        [("single_buffer_weights", lambda: build(True)),
         ("double_buffer_weights", lambda: build(False))])


# ----------------------------------------------------------------------------
# Module wrapper mirroring the PyTorch TransformerEmbedder.
# ----------------------------------------------------------------------------
class TransformerEmbedder:
    """JAX/Pallas mirror of TransformerEmbedder (x-transformers Encoder)."""

    def __init__(self, n_embed, n_layer, vocab_size, max_seq_len=77,
                 heads=8, dim_head=64, ff_mult=4, rng=None,
                 compute_dtype=jnp.bfloat16):
        if rng is None:
            rng = jax.random.PRNGKey(0)
        self.n_embed = n_embed
        self.heads = heads
        self.dim_head = dim_head
        self.compute_dtype = compute_dtype
        inner = heads * dim_head
        ff_inner = n_embed * ff_mult

        keys = jax.random.split(rng, 2 + n_layer)

        def nrm(k, shape, std):
            return jax.random.normal(k, shape, jnp.float32) * std

        # TODO(synk): recent x-transformers scales the positional table by dim**-0.5;
        #             this mirrors the plain additive table used by the pinned SD version.
        self.tok_emb = nrm(keys[0], (vocab_size, n_embed), 0.02)
        self.pos_emb = nrm(keys[1], (max_seq_len, n_embed), 0.02)

        self.layers = []
        for li in range(n_layer):
            lk = jax.random.split(keys[2 + li], 6)
            self.layers.append(dict(
                ln1_g=jnp.ones((n_embed,), jnp.float32),
                ln1_b=jnp.zeros((n_embed,), jnp.float32),
                wq=nrm(lk[0], (n_embed, inner), 0.05),
                wk=nrm(lk[1], (n_embed, inner), 0.05),
                wv=nrm(lk[2], (n_embed, inner), 0.05),
                wo=nrm(lk[3], (inner, n_embed), 0.05),
                bo=jnp.zeros((n_embed,), jnp.float32),
                ln2_g=jnp.ones((n_embed,), jnp.float32),
                ln2_b=jnp.zeros((n_embed,), jnp.float32),
                w1=nrm(lk[4], (n_embed, ff_inner), 0.05),
                b1=jnp.zeros((ff_inner,), jnp.float32),
                w2=nrm(lk[5], (ff_inner, n_embed), 0.05),
                b2=jnp.zeros((n_embed,), jnp.float32),
            ))
        self.norm_g = jnp.ones((n_embed,), jnp.float32)
        self.norm_b = jnp.zeros((n_embed,), jnp.float32)

        # Prepare kernel-side weights once: fused bf16 QKV, bf16 matmul weights,
        # f32 LayerNorm params / biases reshaped to (1, dim).
        self._prepped = [self._prep_layer(p) for p in self.layers]

    def _prep_layer(self, p):
        d = self.n_embed
        cdt = self.compute_dtype
        ffi = p['w1'].shape[1]
        return dict(
            ln1_g=p['ln1_g'].reshape(1, d), ln1_b=p['ln1_b'].reshape(1, d),
            wqkv=jnp.concatenate([p['wq'], p['wk'], p['wv']], axis=1).astype(cdt),
            wo=p['wo'].astype(cdt), bo=p['bo'].reshape(1, d),
            ln2_g=p['ln2_g'].reshape(1, d), ln2_b=p['ln2_b'].reshape(1, d),
            w1=p['w1'].astype(cdt), b1=p['b1'].reshape(1, ffi),
            w2=p['w2'].astype(cdt), b2=p['b2'].reshape(1, d),
        )

    def __call__(self, tokens):
        x = embed_tokens(self.tok_emb, self.pos_emb, tokens)
        if not self._prepped:
            return _layer_norm(x, self.norm_g, self.norm_b)
        n = len(self._prepped)
        for li, p in enumerate(self._prepped):
            fused_final = (self.norm_g, self.norm_b) if li == n - 1 else None
            x = encoder_layer(x, p, heads=self.heads, dim_head=self.dim_head,
                              final_norm=fused_final)
        return x

    def encode(self, tokens):
        return self(tokens)


# ----------------------------------------------------------------------------
# Pure-JAX reference (same math & same bf16 matmul operands) for checking.
# ----------------------------------------------------------------------------
def reference_forward(model, tokens):
    cdt = model.compute_dtype
    b, s = tokens.shape
    h_, dh = model.heads, model.dim_head
    inner = h_ * dh
    scale = 1.0 / math.sqrt(float(dh))

    def mm(a, w):
        return jnp.dot(a.astype(cdt), w.astype(cdt),
                       preferred_element_type=jnp.float32)

    x = (model.tok_emb[tokens] + model.pos_emb[:s][None, :, :]).astype(jnp.float32)
    for p in model.layers:
        hn = _layer_norm(x, p['ln1_g'], p['ln1_b'])
        q = mm(hn, p['wq']); k = mm(hn, p['wk']); v = mm(hn, p['wv'])

        def split(t):
            return t.reshape(b, s, h_, dh).transpose(0, 2, 1, 3)

        qh, kh, vh = split(q), split(k), split(v)
        dots = jnp.einsum('bhid,bhjd->bhij', qh.astype(cdt), kh.astype(cdt),
                          preferred_element_type=jnp.float32) * scale
        attn = _softmax_ref(dots)
        o = jnp.einsum('bhij,bhjd->bhid', attn.astype(cdt), vh.astype(cdt),
                       preferred_element_type=jnp.float32)
        o = o.transpose(0, 2, 1, 3).reshape(b, s, inner)
        x = x + mm(o, p['wo']) + p['bo']

        h2 = _layer_norm(x, p['ln2_g'], p['ln2_b'])
        ff = _gelu_tanh(mm(h2, p['w1']) + p['b1'])
        x = x + mm(ff, p['w2']) + p['b2']
    return _layer_norm(x, model.norm_g, model.norm_b)


if __name__ == "__main__":
    n_embed, n_layer, vocab_size, max_seq_len = 32, 2, 64, 16
    batch, seq = 2, 8

    root = jax.random.PRNGKey(0)
    k_model, k_tok = jax.random.split(root)

    model = TransformerEmbedder(n_embed, n_layer, vocab_size, max_seq_len,
                                heads=4, dim_head=16, rng=k_model)
    tokens = jax.random.randint(k_tok, (batch, seq), 0, vocab_size,
                                dtype=jnp.int32)

    z = model(tokens)
    z = jax.block_until_ready(z)

    ref = reference_forward(model, tokens)
    assert z.shape == (batch, seq, n_embed), z.shape
    max_err = float(jnp.max(jnp.abs(z.astype(jnp.float32) - ref)))
    # bf16 matmul operands + approx EUP reciprocal in the kernel softmax -> 2e-2 tol.
    assert jnp.allclose(z.astype(jnp.float32), ref, atol=2e-2, rtol=2e-2), \
        f"max abs err {max_err}"

    print("KERNEL_OK")
</pallas_src>

<mosaic_0001>
module attributes {stable_mosaic.version = 11 : i64} {
  func.func @_embed_kernel_onehot(%arg0: i32, %arg1: memref<1x1x16xi32, #tpu.memory_space<vmem>>, %arg2: memref<1x1x16xi32, #tpu.memory_space<vmem>>, %arg3: memref<64x32xf32, #tpu.memory_space<vmem>>, %arg4: memref<16x32xf32, #tpu.memory_space<vmem>>, %arg5: memref<16x32xf32, #tpu.memory_space<vmem>>) attributes {dimension_semantics = [#tpu.dimension_semantics<parallel>], iteration_bounds = array<i64: 1>, scalar_prefetch = 0 : i64, scratch_operands = 0 : i64, tpu.core_type = #tpu.core_type<tc>, window_params = [{transform_indices = @transform_0, window_bounds = array<i64: 1, 1, 16>}, {transform_indices = @transform_1, window_bounds = array<i64: 1, 1, 16>}, {pipeline_mode = #tpu.pipeline_mode<synchronous>, transform_indices = @transform_2, window_bounds = array<i64: 64, 32>}, {pipeline_mode = #tpu.pipeline_mode<synchronous>, transform_indices = @transform_3, window_bounds = array<i64: 16, 32>}, {transform_indices = @transform_4, window_bounds = array<i64: 16, 32>}]} {
    %c0 = arith.constant 0 : index
    %c0_0 = arith.constant 0 : index
    %c0_1 = arith.constant 0 : index
    %0 = vector.load %arg1[%c0, %c0_0, %c0_1] : memref<1x1x16xi32, #tpu.memory_space<vmem>>, vector<1x1x16xi32>
    %1 = vector.shape_cast %0 : vector<1x1x16xi32> to vector<1x16xi32>
    %c0_2 = arith.constant 0 : index
    %c0_3 = arith.constant 0 : index
    %2 = vector.load %arg3[%c0_2, %c0_3] : memref<64x32xf32, #tpu.memory_space<vmem>>, vector<64x32xf32>
    %3 = tpu.iota {dimensions = array<i32: 0>} : vector<64x16xi32>
    %4 = vector.broadcast %1 : vector<1x16xi32> to vector<64x16xi32>
    %5 = arith.cmpi eq, %3, %4 : vector<64x16xi32>
    %6 = arith.extui %5 : vector<64x16xi1> to vector<64x16xi32>
    %7 = arith.sitofp %6 : vector<64x16xi32> to vector<64x16xf32>
    %cst = arith.constant dense<0.000000e+00> : vector<16x32xf32>
    %8 = tpu.matmul %7, %2, %cst {dimension_numbers = #tpu.dot_dimension_numbers<[0], [0], [1], [1], [0, 1, 1, 1], [], []>} : vector<64x16xf32>, vector<64x32xf32>, vector<16x32xf32> -> vector<16x32xf32>
    %c0_4 = arith.constant 0 : index
    %c0_5 = arith.constant 0 : index
    %c0_6 = arith.constant 0 : index
    %9 = vector.load %arg2[%c0_4, %c0_5, %c0_6] : memref<1x1x16xi32, #tpu.memory_space<vmem>>, vector<1x1x16xi32>
    %10 = vector.shape_cast %9 : vector<1x1x16xi32> to vector<1x16xi32>
    %c0_7 = arith.constant 0 : index
    %c0_8 = arith.constant 0 : index
    %11 = vector.load %arg4[%c0_7, %c0_8] : memref<16x32xf32, #tpu.memory_space<vmem>>, vector<16x32xf32>
    %12 = tpu.iota {dimensions = array<i32: 0>} : vector<16x16xi32>
    %13 = vector.broadcast %10 : vector<1x16xi32> to vector<16x16xi32>
    %14 = arith.cmpi eq, %12, %13 : vector<16x16xi32>
    %15 = arith.extui %14 : vector<16x16xi1> to vector<16x16xi32>
    %16 = arith.sitofp %15 : vector<16x16xi32> to vector<16x16xf32>
    %cst_9 = arith.constant dense<0.000000e+00> : vector<16x32xf32>
    %17 = tpu.matmul %16, %11, %cst_9 {dimension_numbers = #tpu.dot_dimension_numbers<[0], [0], [1], [1], [0, 1, 1, 1], [], []>} : vector<16x16xf32>, vector<16x32xf32>, vector<16x32xf32> -> vector<16x32xf32>
    %18 = arith.addf %8, %17 : vector<16x32xf32>
    %c0_10 = arith.constant 0 : index
    %c0_11 = arith.constant 0 : index
    %19 = vector.load %arg5[%c0_10, %c0_11] : memref<16x32xf32, #tpu.memory_space<vmem>>, vector<16x32xf32>
    tpu.vector_store %arg5[%c0_10, %c0_11], %18 {strides = array<i32>} : memref<16x32xf32, #tpu.memory_space<vmem>>, vector<16x32xf32>,
    return
  }
  func.func @transform_0(%arg0: i32) -> (i32, i32, i32) {
    %c0_i32 = arith.constant 0 : i32
    %c0_i32_0 = arith.constant 0 : i32
    %c0_i32_1 = arith.constant 0 : i32
    return %arg0, %c0_i32, %c0_i32_0 : i32, i32, i32
  }
  func.func @transform_1(%arg0: i32) -> (i32, i32, i32) {
    %c0_i32 = arith.constant 0 : i32
    %c0_i32_0 = arith.constant 0 : i32
    %c0_i32_1 = arith.constant 0 : i32
    return %arg0, %c0_i32, %c0_i32_0 : i32, i32, i32
  }
  func.func @transform_2(%arg0: i32) -> (i32, i32) {
    %c0_i32 = arith.constant 0 : i32
    %c0_i32_0 = arith.constant 0 : i32
    %c0_i32_1 = arith.constant 0 : i32
    return %c0_i32, %c0_i32_0 : i32, i32
  }
  func.func @transform_3(%arg0: i32) -> (i32, i32) {
    %c0_i32 = arith.constant 0 : i32
    %c0_i32_0 = arith.constant 0 : i32
    %c0_i32_1 = arith.constant 0 : i32
    return %c0_i32, %c0_i32_0 : i32, i32
  }
  func.func @transform_4(%arg0: i32) -> (i32, i32) {
    %c0_i32 = arith.constant 0 : i32
    %c0_i32_0 = arith.constant 0 : i32
    return %arg0, %c0_i32 : i32, i32
  }
}

module attributes {stable_mosaic.version = 11 : i64} {
  func.func @_embed_kernel_onehot(%arg0: i32, %arg1: memref<1x1x16xi32, #tpu.memory_space<vmem>>, %arg2: memref<1x1x16xi32, #tpu.memory_space<vmem>>, %arg3: memref<64x32xf32, #tpu.memory_space<vmem>>, %arg4: memref<16x32xf32, #tpu.memory_space<vmem>>, %arg5: memref<16x32xf32, #tpu.memory_space<vmem>>) attributes {dimension_semantics = [#tpu.dimension_semantics<parallel>], iteration_bounds = array<i64: 1>, scalar_prefetch = 0 : i64, scratch_operands = 0 : i64, tpu.core_type = #tpu.core_type<tc>, window_params = [{transform_indices = @transform_0, window_bounds = array<i64: 1, 1, 16>}, {transform_indices = @transform_1, window_bounds = array<i64: 1, 1, 16>}, {pipeline_mode = #tpu.pipeline_mode<synchronous>, transform_indices = @transform_2, window_bounds = array<i64: 64, 32>}, {pipeline_mode = #tpu.pipeline_mode<synchronous>, transform_indices = @transform_3, window_bounds = array<i64: 16, 32>}, {transform_indices = @transform_4, window_bounds = array<i64: 16, 32>}]} {
    %c0 = arith.constant 0 : index
    %c0_0 = arith.constant 0 : index
    %c0_1 = arith.constant 0 : index
    %0 = vector.load %arg1[%c0, %c0_0, %c0_1] : memref<1x1x16xi32, #tpu.memory_space<vmem>>, vector<1x1x16xi32>
    %1 = vector.shape_cast %0 : vector<1x1x16xi32> to vector<1x16xi32>
    %c0_2 = arith.constant 0 : index
    %c0_3 = arith.constant 0 : index
    %2 = vector.load %arg3[%c0_2, %c0_3] : memref<64x32xf32, #tpu.memory_space<vmem>>, vector<64x32xf32>
    %3 = tpu.iota {dimensions = array<i32: 0>} : vector<64x16xi32>
    %4 = vector.broadcast %1 : vector<1x16xi32> to vector<64x16xi32>
    %5 = arith.cmpi eq, %3, %4 : vector<64x16xi32>
    %6 = arith.extui %5 : vector<64x16xi1> to vector<64x16xi32>
    %7 = arith.sitofp %6 : vector<64x16xi32> to vector<64x16xf32>
    %cst = arith.constant dense<0.000000e+00> : vector<16x32xf32>
    %8 = tpu.matmul %7, %2, %cst {dimension_numbers = #tpu.dot_dimension_numbers<[0], [0], [1], [1], [0, 1, 1, 1], [], []>} : vector<64x16xf32>, vector<64x32xf32>, vector<16x32xf32> -> vector<16x32xf32>
    %c0_4 = arith.constant 0 : index
    %c0_5 = arith.constant 0 : index
    %c0_6 = arith.constant 0 : index
    %9 = vector.load %arg2[%c0_4, %c0_5, %c0_6] : memref<1x1x16xi32, #tpu.memory_space<vmem>>, vector<1x1x16xi32>
    %10 = vector.shape_cast %9 : vector<1x1x16xi32> to vector<1x16xi32>
    %c0_7 = arith.constant 0 : index
    %c0_8 = arith.constant 0 : index
    %11 = vector.load %arg4[%c0_7, %c0_8] : memref<16x32xf32, #tpu.memory_space<vmem>>, vector<16x32xf32>
    %12 = tpu.iota {dimensions = array<i32: 0>} : vector<16x16xi32>
    %13 = vector.broadcast %10 : vector<1x16xi32> to vector<16x16xi32>
    %14 = arith.cmpi eq, %12, %13 : vector<16x16xi32>
    %15 = arith.extui %14 : vector<16x16xi1> to vector<16x16xi32>
    %16 = arith.sitofp %15 : vector<16x16xi32> to vector<16x16xf32>
    %cst_9 = arith.constant dense<0.000000e+00> : vector<16x32xf32>
    %17 = tpu.matmul %16, %11, %cst_9 {dimension_numbers = #tpu.dot_dimension_numbers<[0], [0], [1], [1], [0, 1, 1, 1], [], []>} : vector<16x16xf32>, vector<16x32xf32>, vector<16x32xf32> -> vector<16x32xf32>
    %18 = arith.addf %8, %17 : vector<16x32xf32>
    %c0_10 = arith.constant 0 : index
    %c0_11 = arith.constant 0 : index
    %19 = vector.load %arg5[%c0_10, %c0_11] : memref<16x32xf32, #tpu.memory_space<vmem>>, vector<16x32xf32>
    tpu.vector_store %arg5[%c0_10, %c0_11], %18 {strides = array<i32>} : memref<16x32xf32, #tpu.memory_space<vmem>>, vector<16x32xf32>,
    return
  }
  func.func @transform_0(%arg0: i32) -> (i32, i32, i32) {
    %c0_i32 = arith.constant 0 : i32
    %c0_i32_0 = arith.constant 0 : i32
    %c0_i32_1 = arith.constant 0 : i32
    return %arg0, %c0_i32, %c0_i32_0 : i32, i32, i32
  }
  func.func @transform_1(%arg0: i32) -> (i32, i32, i32) {
    %c0_i32 = arith.constant 0 : i32
    %c0_i32_0 = arith.constant 0 : i32
    %c0_i32_1 = arith.constant 0 : i32
    return %arg0, %c0_i32, %c0_i32_0 : i32, i32, i32
  }
  func.func @transform_2(%arg0: i32) -> (i32, i32) {
    %c0_i32 = arith.constant 0 : i32
    %c0_i32_0 = arith.constant 0 : i32
    %c0_i32_1 = arith.constant 0 : i32
    return %c0_i32, %c0_i32_0 : i32, i32
  }
  func.func @transform_3(%arg0: i32) -> (i32, i32) {
    %c0_i32 = arith.constant 0 : i32
    %c0_i32_0 = arith.constant 0 : i32
    %c0_i32_1 = arith.constant 0 : i32
    return %c0_i32, %c0_i32_0 : i32, i32
  }
  func.func @transform_4(%arg0: i32) -> (i32, i32) {
    %c0_i32 = arith.constant 0 : i32
    %c0_i32_0 = arith.constant 0 : i32
    return %arg0, %c0_i32 : i32, i32
  }
}

</mosaic_0001>

<bundles_post_ra>
// kernel: tpu_custom_call.1
= control target key start
LH: loop header
LB: loop body
LE: loop exit
PB: predicated region body
PF: predicated region fallthrough
CT: control target
= control target key end

     0   :  { %v27_v0 = vlaneseq  ;;  %s484_s0 = inlined_call_operand.vmem [shape: s32[1,1,16], index: 0, kind: input, shape index: {}]   ;;  %s485_s1 = inlined_call_operand.vmem [shape: s32[1,1,16], index: 1, kind: input, shape index: {}]   ;;  %s486_s2 = inlined_call_operand.vmem [shape: f32[64,32], index: 2, kind: input, shape index: {}]   ;;  %s487_s3 = inlined_call_operand.vmem [shape: f32[16,32], index: 3, kind: input, shape index: {}]   ;;  %s488_s4 = inlined_call_operand.hbm [shape: f32[16,32], index: 4, kind: output, shape index: {}]  }
   0x1   :  { %v26_v1 = vld [vmem:[%s486_s2 + $0x38] sm:$0xff]  ;;  %v333_v2 = vld [vmem:[%s485_s1] ss:$0 sm:$0xff]  ;;  %v25_v4 = vld [vmem:[%s486_s2 + $0x30] sm:$0xff] }
   0x2   :  { %v444_v3 = vld [vmem:[%s484_s0] ss:$0 sm:$0xff]  ;;  %361 = vmatprep.subr.mxu1 %v26_v1  ;;  %v28_v5 = vshrl.u32 %v27_v0, 7  ;;  %v24_v6 = vld [vmem:[%s486_s2 + $0x28] sm:$0xff] }
   0x3   :  { %362 = vmatpush3.msra.mxu1 %v26_v1  ;;  %v66_v7 = vld [vmem:[%s487_s3 + $0x8] sm:$0xff]  ;;  %v65_v8 = vld [vmem:[%s487_s3] sm:$0xff] }
   0x4   :  { %363 = vmatprep.subr.mxu1 %v25_v4  ;;  %354 = vmatprep.subr.mxu0 %v66_v7  ;;  %vm71_vm0 = vcmp.eq.s32.totalorder %v28_v5, %v333_v2  ;;  %vm40_vm1 = vcmp.eq.s32.totalorder %v28_v5, %v444_v3  ;;  %v29_v9 = vadd.s32 8, %v28_v5  ;;  %v30_v10 = vadd.s32 16, %v28_v5 }
   0x5   :  { %364 = vmatpush3.msra.mxu1 %v25_v4  ;;  %355 = vmatpush3.msra.mxu0 %v66_v7 }
   0x6   :  { %9 = vsyncpa [#allocation3], 0  ;;  %v406_v11 = vmov 0.0   ;;  %365 = vmatprep.subr.mxu1 %v24_v6  ;;  %v23_v14 = vld [vmem:[%s486_s2 + $0x20] sm:$0xff]  ;;  %356 = vmatprep.subr.mxu0 %v65_v8  ;;  %vm72_vm2 = vcmp.eq.s32.totalorder %v29_v9, %v333_v2  ;;  %vm41_vm3 = vcmp.eq.s32.totalorder %v29_v9, %v444_v3  ;;  %vm42_vm4 = vcmp.eq.s32.totalorder %v30_v10, %v444_v3  ;;  %v22_v18 = vld [vmem:[%s486_s2 + $0x18] sm:$0xff] }
   0x7   :  { %v334_v12 = vsel %vm71_vm0, 1.0, %v406_v11  ;;  %v325_v13 = vsel %vm40_vm1, 1.0, %v406_v11  ;;  %v335_v15 = vsel %vm72_vm2, 1.0, %v406_v11  ;;  %v326_v16 = vsel %vm41_vm3, 1.0, %v406_v11  ;;  %366 = vmatpush3.msra.mxu1 %v24_v6  ;;  %357 = vmatpush3.msra.mxu0 %v65_v8  ;;  %v21_v19 = vld [vmem:[%s486_s2 + $0x10] sm:$0xff]  ;;  %v20_v22 = vld [vmem:[%s486_s2 + $0x8] sm:$0xff] }
   0x8   :  { %77 = vxpose.xlu0.b32.start [1/2] (short) (narrow) %v334_v12, 16  ;;  %191 = vxpose.xlu1.b32.start [1/8] (short) (narrow) %v325_v13, 16  ;;  %v31_v17 = vadd.s32 24, %v28_v5  ;;  %v327_v20 = vsel %vm42_vm4, 1.0, %v406_v11  ;;  %v32_v21 = vadd.s32 32, %v28_v5  ;;  %v19_v23 = vld [vmem:[%s486_s2] sm:$0xff] }
   0x9   :  { %367 = vmatprep.subr.mxu1 %v23_v14  ;;  %v33_v25 = vadd.s32 40, %v28_v5  ;;  %v34_v27 = vadd.s32 48, %v28_v5  ;;  %v35_v29 = vadd.s32 56, %v28_v5  ;;  %vm109_vm10 = vcmask 130048   ;;  %s407_s2 = smov [#allocation2]  }
   0xa   :  { %368 = vmatpush3.msra.mxu1 %v23_v14  ;;  %vm43_vm5 = vcmp.eq.s32.totalorder %v31_v17, %v444_v3  ;;  %vm44_vm6 = vcmp.eq.s32.totalorder %v32_v21, %v444_v3  ;;  %vm223_vm11 = vcmask 523264   ;;  %s313_s10 = sshll.u32 %s407_s2, 4  ;;  %vm305_vm12 = vcmask 261120   ;;  %s314_s10 = int_to_ptr.vmem [resolvable:$true] %s313_s10 }
   0xb   :  { %369 = vmatprep.subr.mxu1 %v22_v18  ;;  %v328_v24 = vsel %vm43_vm5, 1.0, %v406_v11  ;;  %v329_v26 = vsel %vm44_vm6, 1.0, %v406_v11  ;;  %vm45_vm7 = vcmp.eq.s32.totalorder %v33_v25, %v444_v3  ;;  %vm46_vm8 = vcmp.eq.s32.totalorder %v34_v27, %v444_v3  ;;  %s384_s11 = scalar_lea.vmem %s314_s10, 256  ;;  %p389_p1 = scmp.lt.s32.totalorder %s314_s10, %s314_s10 }
   0xc   :  { %78 = vxpose.xlu0.b32.end [2/2] (short) (narrow) %v335_v15, 16  ;;  %192 = vxpose.xlu1.b32.cont [2/8] (short) (narrow) %v326_v16, 16  ;;  %v330_v28 = vsel %vm45_vm7, 1.0, %v406_v11  ;;  %v331_v30 = vsel %vm46_vm8, 1.0, %v406_v11  ;;  %vm47_vm9 = vcmp.eq.s32.totalorder %v35_v29, %v444_v3  ;;  %p385_p0 = scmp.ne.s32.totalorder %s314_s10, %s384_s11  ;;  %p390_p2 = scmp.lt.s32.totalorder %s384_s11, %s384_s11 }
   0xd   :  { %370 = vmatpush3.msra.mxu1 %v22_v18  ;;  %v332_v31 = vsel %vm47_vm9, 1.0, %v406_v11 }
   0xe   :  { %371 = vmatprep.subr.mxu1 %v21_v19  ;;  %p391_p3 = por %p390_p2, %p389_p1 }
   0xf   :  { %372 = vmatpush3.msra.mxu1 %v21_v19 }
  0x10   :  { %193 = vxpose.xlu1.b32.cont [3/8] (short) (narrow) %v327_v20, 16  ;;  %373 = vmatprep.subr.mxu1 %v20_v22  ;;  %p392_p4 = pnand %p391_p3, %p385_p0 }
  0x11   :  { %374 = vmatpush3.msra.mxu1 %v20_v22 }
  0x12   :  { %375 = vmatprep.subr.mxu1 %v19_v23 }
  0x13   :  { %376 = vmatpush3.msra.mxu1 %v19_v23 }
  0x14   :  { %194 = vxpose.xlu1.b32.cont [4/8] (short) (narrow) %v328_v24, 16 }
  0x18   :  { %195 = vxpose.xlu1.b32.cont [5/8] (short) (narrow) %v329_v26, 16 }
  0x1c   :  { %196 = vxpose.xlu1.b32.cont [6/8] (short) (narrow) %v330_v28, 16 }
  0x20   :  { %197 = vxpose.xlu1.b32.cont [7/8] (short) (narrow) %v331_v30, 16 }
  0x24   :  { %198 = vxpose.xlu1.b32.end [8/8] (short) (narrow) %v332_v31, 16 }
  0x84   :  { %v93_v32 = vpop.trf.xlu0  ;;  %v207_v33 = vpop.trf.xlu1 }
  0x85   :  { %358 = vmatprep.mubr.msk.f32.mxu0 %vm109_vm10, %v93_v32  ;;  %377 = vmatprep.mubr.msk.f32.mxu1 %vm223_vm11, %v207_v33 }
  0x88   :  { %v94_v34 = vpop.trf.xlu0  ;;  %v208_v35 = vpop.trf.xlu1 }
  0x89   :  { %359 = vmatmul.mubr.msk.f32.vlgmr.msra.gmra.mxu0 %vm109_vm10, %v94_v34  ;;  %378 = vmatmul.mubr.msk.f32.vlgmr.msra.gmra.mxu1 %vm223_vm11, %v208_v35 }
 0x149   :  { %v360_v36 = vpop.f32.mrf.mxu0  ;;  %v379_v37 = vpop.f32.mrf.mxu1 }
 0x14a   :  { %v302_v38 = vadd.f32 %v379_v37, %v360_v36 }
 0x14b   :  { %v182_v39 = vpop.f32.mrf.mxu0  ;;  %v296_v40 = vpop.f32.mrf.mxu1 }
 0x14c   :  { %307 = vst.msk [vmem:[#allocation2 + $0x8] sm:$0xff] %vm305_vm12, %v302_v38  ;;  %v297_v41 = vadd.f32 %v296_v40, %v182_v39 }
 0x14e   :  { %306 = vst.msk [vmem:[#allocation2] sm:$0xff] %vm305_vm12, %v297_v41 }
 0x14f   :  { %395 = shalt.err (!%p392_p4)
}
 0x150   :  { %s408_s12 = smov 128   ;;  %s409_s13 = smov 8  }
 0x151   :  { %319 = dma.vmem_to_hbm [thread:$0]  %s314_s10, 256, %s488_s4, [#allocation3], %s408_s12, %s408_s12, %s409_s13  }
 0x152   :  { %404 = dma.done.wait [#allocation3], 256  }
 0x153   :  { %405 = vsyncadd [#allocation3], 4294967040 }
 0x154   :  { %323 = vsyncpa [#allocation3], 1 }

// kernel: tpu_custom_call.1
= control target key start
LH: loop header
LB: loop body
LE: loop exit
PB: predicated region body
PF: predicated region fallthrough
CT: control target
= control target key end

     0   :  { %v27_v0 = vlaneseq  ;;  %s484_s0 = inlined_call_operand.vmem [shape: s32[1,1,16], index: 0, kind: input, shape index: {}]   ;;  %s485_s1 = inlined_call_operand.vmem [shape: s32[1,1,16], index: 1, kind: input, shape index: {}]   ;;  %s486_s2 = inlined_call_operand.vmem [shape: f32[64,32], index: 2, kind: input, shape index: {}]   ;;  %s487_s3 = inlined_call_operand.vmem [shape: f32[16,32], index: 3, kind: input, shape index: {}]   ;;  %s488_s4 = inlined_call_operand.hbm [shape: f32[16,32], index: 4, kind: output, shape index: {}]  }
   0x1   :  { %v26_v1 = vld [vmem:[%s486_s2 + $0x38] sm:$0xff]  ;;  %v333_v2 = vld [vmem:[%s485_s1] ss:$0 sm:$0xff]  ;;  %v25_v4 = vld [vmem:[%s486_s2 + $0x30] sm:$0xff] }
   0x2   :  { %v444_v3 = vld [vmem:[%s484_s0] ss:$0 sm:$0xff]  ;;  %361 = vmatprep.subr.mxu1 %v26_v1  ;;  %v28_v5 = vshrl.u32 %v27_v0, 7  ;;  %v24_v6 = vld [vmem:[%s486_s2 + $0x28] sm:$0xff] }
   0x3   :  { %362 = vmatpush3.msra.mxu1 %v26_v1  ;;  %v66_v7 = vld [vmem:[%s487_s3 + $0x8] sm:$0xff]  ;;  %v65_v8 = vld [vmem:[%s487_s3] sm:$0xff] }
   0x4   :  { %363 = vmatprep.subr.mxu1 %v25_v4  ;;  %354 = vmatprep.subr.mxu0 %v66_v7  ;;  %vm71_vm0 = vcmp.eq.s32.totalorder %v28_v5, %v333_v2  ;;  %vm40_vm1 = vcmp.eq.s32.totalorder %v28_v5, %v444_v3  ;;  %v29_v9 = vadd.s32 8, %v28_v5  ;;  %v30_v10 = vadd.s32 16, %v28_v5 }
   0x5   :  { %364 = vmatpush3.msra.mxu1 %v25_v4  ;;  %355 = vmatpush3.msra.mxu0 %v66_v7 }
   0x6   :  { %9 = vsyncpa [#allocation3], 0  ;;  %v406_v11 = vmov 0.0   ;;  %365 = vmatprep.subr.mxu1 %v24_v6  ;;  %v23_v14 = vld [vmem:[%s486_s2 + $0x20] sm:$0xff]  ;;  %356 = vmatprep.subr.mxu0 %v65_v8  ;;  %vm72_vm2 = vcmp.eq.s32.totalorder %v29_v9, %v333_v2  ;;  %vm41_vm3 = vcmp.eq.s32.totalorder %v29_v9, %v444_v3  ;;  %vm42_vm4 = vcmp.eq.s32.totalorder %v30_v10, %v444_v3  ;;  %v22_v18 = vld [vmem:[%s486_s2 + $0x18] sm:$0xff] }
   0x7   :  { %v334_v12 = vsel %vm71_vm0, 1.0, %v406_v11  ;;  %v325_v13 = vsel %vm40_vm1, 1.0, %v406_v11  ;;  %v335_v15 = vsel %vm72_vm2, 1.0, %v406_v11  ;;  %v326_v16 = vsel %vm41_vm3, 1.0, %v406_v11  ;;  %366 = vmatpush3.msra.mxu1 %v24_v6  ;;  %357 = vmatpush3.msra.mxu0 %v65_v8  ;;  %v21_v19 = vld [vmem:[%s486_s2 + $0x10] sm:$0xff]  ;;  %v20_v22 = vld [vmem:[%s486_s2 + $0x8] sm:$0xff] }
   0x8   :  { %77 = vxpose.xlu0.b32.start [1/2] (short) (narrow) %v334_v12, 16  ;;  %191 = vxpose.xlu1.b32.start [1/8] (short) (narrow) %v325_v13, 16  ;;  %v31_v17 = vadd.s32 24, %v28_v5  ;;  %v327_v20 = vsel %vm42_vm4, 1.0, %v406_v11  ;;  %v32_v21 = vadd.s32 32, %v28_v5  ;;  %v19_v23 = vld [vmem:[%s486_s2] sm:$0xff] }
   0x9   :  { %367 = vmatprep.subr.mxu1 %v23_v14  ;;  %v33_v25 = vadd.s32 40, %v28_v5  ;;  %v34_v27 = vadd.s32 48, %v28_v5  ;;  %v35_v29 = vadd.s32 56, %v28_v5  ;;  %vm109_vm10 = vcmask 130048   ;;  %s407_s2 = smov [#allocation2]  }
   0xa   :  { %368 = vmatpush3.msra.mxu1 %v23_v14  ;;  %vm43_vm5 = vcmp.eq.s32.totalorder %v31_v17, %v444_v3  ;;  %vm44_vm6 = vcmp.eq.s32.totalorder %v32_v21, %v444_v3  ;;  %vm223_vm11 = vcmask 523264   ;;  %s313_s10 = sshll.u32 %s407_s2, 4  ;;  %vm305_vm12 = vcmask 261120   ;;  %s314_s10 = int_to_ptr.vmem [resolvable:$true] %s313_s10 }
   0xb   :  { %369 = vmatprep.subr.mxu1 %v22_v18  ;;  %v328_v24 = vsel %vm43_vm5, 1.0, %v406_v11  ;;  %v329_v26 = vsel %vm44_vm6, 1.0, %v406_v11  ;;  %vm45_vm7 = vcmp.eq.s32.totalorder %v33_v25, %v444_v3  ;;  %vm46_vm8 = vcmp.eq.s32.totalorder %v34_v27, %v444_v3  ;;  %s384_s11 = scalar_lea.vmem %s314_s10, 256  ;;  %p389_p1 = scmp.lt.s32.totalorder %s314_s10, %s314_s10 }
   0xc   :  { %78 = vxpose.xlu0.b32.end [2/2] (short) (narrow) %v335_v15, 16  ;;  %192 = vxpose.xlu1.b32.cont [2/8] (short) (narrow) %v326_v16, 16  ;;  %v330_v28 = vsel %vm45_vm7, 1.0, %v406_v11  ;;  %v331_v30 = vsel %vm46_vm8, 1.0, %v406_v11  ;;  %vm47_vm9 = vcmp.eq.s32.totalorder %v35_v29, %v444_v3  ;;  %p385_p0 = scmp.ne.s32.totalorder %s314_s10, %s384_s11  ;;  %p390_p2 = scmp.lt.s32.totalorder %s384_s11, %s384_s11 }
   0xd   :  { %370 = vmatpush3.msra.mxu1 %v22_v18  ;;  %v332_v31 = vsel %vm47_vm9, 1.0, %v406_v11 }
   0xe   :  { %371 = vmatprep.subr.mxu1 %v21_v19  ;;  %p391_p3 = por %p390_p2, %p389_p1 }
   0xf   :  { %372 = vmatpush3.msra.mxu1 %v21_v19 }
  0x10   :  { %193 = vxpose.xlu1.b32.cont [3/8] (short) (narrow) %v327_v20, 16  ;;  %373 = vmatprep.subr.mxu1 %v20_v22  ;;  %p392_p4 = pnand %p391_p3, %p385_p0 }
  0x11   :  { %374 = vmatpush3.msra.mxu1 %v20_v22 }
  0x12   :  { %375 = vmatprep.subr.mxu1 %v19_v23 }
  0x13   :  { %376 = vmatpush3.msra.mxu1 %v19_v23 }
  0x14   :  { %194 = vxpose.xlu1.b32.cont [4/8] (short) (narrow) %v328_v24, 16 }
  0x18   :  { %195 = vxpose.xlu1.b32.cont [5/8] (short) (narrow) %v329_v26, 16 }
  0x1c   :  { %196 = vxpose.xlu1.b32.cont [6/8] (short) (narrow) %v330_v28, 16 }
  0x20   :  { %197 = vxpose.xlu1.b32.cont [7/8] (short) (narrow) %v331_v30, 16 }
  0x24   :  { %198 = vxpose.xlu1.b32.end [8/8] (short) (narrow) %v332_v31, 16 }
  0x84   :  { %v93_v32 = vpop.trf.xlu0  ;;  %v207_v33 = vpop.trf.xlu1 }
  0x85   :  { %358 = vmatprep.mubr.msk.f32.mxu0 %vm109_vm10, %v93_v32  ;;  %377 = vmatprep.mubr.msk.f32.mxu1 %vm223_vm11, %v207_v33 }
  0x88   :  { %v94_v34 = vpop.trf.xlu0  ;;  %v208_v35 = vpop.trf.xlu1 }
  0x89   :  { %359 = vmatmul.mubr.msk.f32.vlgmr.msra.gmra.mxu0 %vm109_vm10, %v94_v34  ;;  %378 = vmatmul.mubr.msk.f32.vlgmr.msra.gmra.mxu1 %vm223_vm11, %v208_v35 }
 0x149   :  { %v360_v36 = vpop.f32.mrf.mxu0  ;;  %v379_v37 = vpop.f32.mrf.mxu1 }
 0x14a   :  { %v302_v38 = vadd.f32 %v379_v37, %v360_v36 }
 0x14b   :  { %v182_v39 = vpop.f32.mrf.mxu0  ;;  %v296_v40 = vpop.f32.mrf.mxu1 }
 0x14c   :  { %307 = vst.msk [vmem:[#allocation2 + $0x8] sm:$0xff] %vm305_vm12, %v302_v38  ;;  %v297_v41 = vadd.f32 %v296_v40, %v182_v39 }
 0x14e   :  { %306 = vst.msk [vmem:[#allocation2] sm:$0xff] %vm305_vm12, %v297_v41 }
 0x14f   :  { %395 = shalt.err (!%p392_p4)
}
 0x150   :  { %s408_s12 = smov 128   ;;  %s409_s13 = smov 8  }
 0x151   :  { %319 = dma.vmem_to_hbm [thread:$0]  %s314_s10, 256, %s488_s4, [#allocation3], %s408_s12, %s408_s12, %s409_s13  }
 0x152   :  { %404 = dma.done.wait [#allocation3], 256  }
 0x153   :  { %405 = vsyncadd [#allocation3], 4294967040 }
 0x154   :  { %323 = vsyncpa [#allocation3], 1 }

</bundles_post_ra>
